<compile_context>
chip_gen: v6e
topology: v6e:2x2x1
jax: 0.10.0
libtpu: 0.0.40
codegen_flags: <defaults>
</compile_context>

<pallas_src>
import numpy as np
import jax
import jax.numpy as jnp
from jax import lax
from jax.experimental import pallas as pl
from jax.experimental.pallas import tpu as pltpu

_MiB = 1024 * 1024


def _make_clip_kernel(A: float):
    # Plain Python float so it is inlined as a literal (a closed-over 0-d jnp
    # array would trigger "captures constants").
    A = float(A)

    def clip_kernel(x_ref, o_ref):
        x = x_ref[...]                 # (TM, K) f32, lanes = interleaved re/im
        L = x.shape[-1]                # static, even
        s = x * x
        # Pair-sum along the lane axis without deinterleaving (XLU rolls are
        # effectively free here -- the kernel is HBM-bound):
        #   even lane j: |z|^2 = s[j] + s[j+1]
        #   odd  lane j: |z|^2 = s[j] + s[j-1]
        s_next = pltpu.roll(s, L - 1, axis=1)   # s_next[j] = s[(j+1) % L]
        s_prev = pltpu.roll(s, 1, axis=1)       # s_prev[j] = s[(j-1) % L]
        lane = lax.broadcasted_iota(jnp.int32, s.shape, 1)
        amp_sq = s + jnp.where((lane & 1) == 0, s_next, s_prev)
        # scale = min(A / sqrt(amp_sq), 1) via one full-precision rsqrt (EUP).
        # Do NOT switch to an approx reciprocal-sqrt (per review).
        # amp_sq == 0 -> inf -> clamps to 1 -> x*1 = 0, matching the reference.
        scale = jnp.minimum(A * lax.rsqrt(amp_sq), 1.0)
        o_ref[...] = x * scale

    return clip_kernel


def _vmem_capacity_bytes() -> int:
    """Physical VMEM per core; conservative (v7x-sized) fallback if unknown."""
    try:
        cap = getattr(pltpu.get_tpu_info(), "vmem_capacity_bytes", None)
        if cap:
            return int(cap)
    except Exception:
        pass
    return 64 * _MiB


def _choose_row_len(total: int):
    """Pick a lane-dense row length K (multiple of 128) for the flat buffer.

    Returns (K, pad): pad == 0 whenever total is a multiple of 128 (the common
    case -> pure no-copy reshape).  Otherwise pad to the next multiple of 128;
    this rare path costs one extra HBM pass each way (a bulk+tail split would
    cost the same via slice/concat copies), so keep the simple proven path."""
    for cand in range(1024, 127, -128):        # largest multiple of 128 <= 1024
        if total % cand == 0:
            return cand, 0
    K = 128
    return K, (-total) % K


def _choose_tile_rows(rows: int, K: int, tile_budget_bytes: int) -> int:
    """Rows per block: large enough to amortize the ~0.35us/step cost, small
    enough to fit the VMEM budget AND leave >= ~4 grid steps so the pipeline
    overlaps DMA with compute and v7x can shard rows over both TensorCores."""
    if rows <= 8:
        return rows                               # block dim == full dim -> legal
    budget_rows = max(8, (tile_budget_bytes // (K * 4) // 8) * 8)
    steps_rows = max(8, ((rows // 4) // 8) * 8)   # keep >= ~4 grid steps
    tm = max(8, min(budget_rows, steps_rows))
    # Prefer a TM (multiple of 8, >= tm/2) that divides rows so no block is
    # partial; otherwise the partial last block is masked by Pallas (safe).
    lo = max(8, (tm // 2 // 8) * 8)
    for cand in range(tm, lo - 1, -8):
        if rows % cand == 0:
            return cand
    return tm


def _clip_forward_impl(x: jax.Array, A_db: int = 1) -> jax.Array:
    """x: [B, C, N, 2] float32 -> [B, C, N, 2] (same semantics as torch Clip)."""
    assert x.ndim == 4 and x.shape[-1] == 2
    orig_shape = x.shape
    A = float(np.sqrt(10 ** (0.1 * A_db) / 64))

    total = x.size
    K, pad = _choose_row_len(total)

    flat = x.reshape(-1)                      # no-copy reshape
    if pad:
        flat = jnp.pad(flat, (0, pad))        # rare ragged fallback
    rows = flat.size // K
    xf = flat.reshape(rows, K)                # re/im pairs stay adjacent (K even)

    # Generation-aware tile budget: ~8 MiB per array per block (<= vmem/8 so
    # the double-buffered 1-in + 1-out pipeline stays ~4x under v7x's 64 MiB
    # physical VMEM and far under v5e/v6e's 128 MiB).
    vmem_cap = _vmem_capacity_bytes()
    tile_budget = min(8 * _MiB, vmem_cap // 8)
    TM = _choose_tile_rows(rows, K, tile_budget)
    grid = (pl.cdiv(rows, TM),)

    # Explicit scoped-VMEM limit: covers 2x(in+out) tiles + internal scratch,
    # capped at 3/4 of physical VMEM (48 MiB on v7x, 64 MiB on v5e/v6e) so the
    # enlarged tiles never trip the 16/32 MiB scoped defaults.
    vmem_limit = int(min(vmem_cap * 3 // 4, 64 * _MiB))

    out = pl.pallas_call(
        _make_clip_kernel(A),
        out_shape=jax.ShapeDtypeStruct((rows, K), x.dtype),
        grid=grid,
        in_specs=[pl.BlockSpec((TM, K), lambda i: (i, 0))],
        out_specs=pl.BlockSpec((TM, K), lambda i: (i, 0)),
        # Elementwise, identical block maps, read-before-write per tile:
        # write the result in place over the (donated) input buffer.
        input_output_aliases={0: 0},
        compiler_params=pltpu.CompilerParams(
            dimension_semantics=("parallel",),   # rows shard over v7x's 2 TCs
            vmem_limit_bytes=vmem_limit,
        ),
    )(xf)

    out_flat = out.reshape(-1)
    if pad:
        out_flat = out_flat[:total]
    return out_flat.reshape(orig_shape)


# Input is donated so the in-place alias inside pallas_call does not force a
# defensive copy.  Callers must not reuse `x` after the call.
clip_forward = jax.jit(_clip_forward_impl, static_argnames=("A_db",),
                       donate_argnums=(0,))


def _reference(x_np: np.ndarray, A_db: int = 1) -> np.ndarray:
    A = np.sqrt(10 ** (0.1 * A_db) / 64)
    amp = np.sqrt(x_np[..., 0] ** 2 + x_np[..., 1] ** 2)
    with np.errstate(divide="ignore"):
        scale = A / amp
    scale = np.where(scale > 1.0, 1.0, scale)
    return x_np * scale[..., None]


if __name__ == "__main__":
    key = jax.random.PRNGKey(0)
    cases = [
        (2, 4, 16),     # small demo shape from the module: [B, C, N, 2]
        (2, 4, 2048),   # multi-block path: exercises grid pipelining / 2 TCs
        (3, 5, 20),     # ragged total (not % 128): exercises padded fallback
    ]
    for idx, (B, C, N) in enumerate(cases):
        k = jax.random.fold_in(key, idx)
        x = jax.random.normal(k, (B, C, N, 2), dtype=jnp.float32)
        x_np = np.asarray(x)                  # host copy BEFORE donation
        out = jax.block_until_ready(clip_forward(x, A_db=1))
        np.testing.assert_allclose(np.asarray(out), _reference(x_np, 1),
                                   rtol=1e-5, atol=1e-5)

    print("KERNEL_OK")
</pallas_src>

<mosaic_0001>
module attributes {stable_mosaic.version = 11 : i64} {
  func.func @clip_kernel(%arg0: i32, %arg1: memref<1x256xf32, #tpu.memory_space<vmem>>, %arg2: memref<1x256xf32, #tpu.memory_space<vmem>>) attributes {dimension_semantics = [#tpu.dimension_semantics<parallel>], iteration_bounds = array<i64: 1>, scalar_prefetch = 0 : i64, scratch_operands = 0 : i64, tpu.core_type = #tpu.core_type<tc>, window_params = [{transform_indices = @transform_0, window_bounds = array<i64: 1, 256>}, {transform_indices = @transform_1, window_bounds = array<i64: 1, 256>}]} {
    %c0 = arith.constant 0 : index
    %c0_0 = arith.constant 0 : index
    %0 = vector.load %arg1[%c0, %c0_0] : memref<1x256xf32, #tpu.memory_space<vmem>>, vector<1x256xf32>
    %1 = arith.mulf %0, %0 : vector<1x256xf32>
    %c255_i32 = arith.constant 255 : i32
    %2 = tpu.dynamic_rotate %1 by %c255_i32 dim 1 : vector<1x256xf32>, i32 -> vector<1x256xf32>
    %c1_i32 = arith.constant 1 : i32
    %3 = tpu.dynamic_rotate %1 by %c1_i32 dim 1 : vector<1x256xf32>, i32 -> vector<1x256xf32>
    %4 = tpu.iota {dimensions = array<i32: 1>} : vector<1x256xi32>
    %c1_i32_1 = arith.constant 1 : i32
    %5 = vector.broadcast %c1_i32_1 : i32 to vector<1x256xi32>
    %6 = arith.andi %4, %5 : vector<1x256xi32>
    %c0_i32 = arith.constant 0 : i32
    %7 = vector.broadcast %c0_i32 : i32 to vector<1x256xi32>
    %8 = arith.cmpi eq, %6, %7 : vector<1x256xi32>
    %9 = arith.select %8, %2, %3 : vector<1x256xi1>, vector<1x256xf32>
    %10 = arith.addf %1, %9 : vector<1x256xf32>
    %11 = math.rsqrt %10 : vector<1x256xf32>
    %cst = arith.constant 0.140252307 : f32
    %12 = vector.broadcast %cst : f32 to vector<1x256xf32>
    %13 = arith.mulf %12, %11 : vector<1x256xf32>
    %cst_2 = arith.constant 1.000000e+00 : f32
    %14 = vector.broadcast %cst_2 : f32 to vector<1x256xf32>
    %15 = arith.minimumf %13, %14 : vector<1x256xf32>
    %16 = arith.mulf %0, %15 : vector<1x256xf32>
    %c0_3 = arith.constant 0 : index
    %c0_4 = arith.constant 0 : index
    %17 = vector.load %arg2[%c0_3, %c0_4] : memref<1x256xf32, #tpu.memory_space<vmem>>, vector<1x256xf32>
    tpu.vector_store %arg2[%c0_3, %c0_4], %16 {strides = array<i32>} : memref<1x256xf32, #tpu.memory_space<vmem>>, vector<1x256xf32>,
    return
  }
  func.func @transform_0(%arg0: i32) -> (i32, i32) {
    %c0_i32 = arith.constant 0 : i32
    %c0_i32_0 = arith.constant 0 : i32
    return %arg0, %c0_i32 : i32, i32
  }
  func.func @transform_1(%arg0: i32) -> (i32, i32) {
    %c0_i32 = arith.constant 0 : i32
    %c0_i32_0 = arith.constant 0 : i32
    return %arg0, %c0_i32 : i32, i32
  }
}

</mosaic_0001>

<bundles_post_ra>
// kernel: _clip_forward_impl.1
= control target key start
LH: loop header
LB: loop body
LE: loop exit
PB: predicated region body
PF: predicated region fallthrough
CT: control target
= control target key end

     0   :  { %v11_v0 = vlaneseq  ;;  %s81_s8 = smov 1   ;;  %s82_s9 = smov 127   ;;  %v83_v10 = vmov 1966171168   ;;  %s100_s0 = inlined_call_operand.vmem [shape: f32[1,256], index: 0, kind: input, shape index: {}, may-alias: {0,1}]   ;;  %s101_s1 = inlined_call_operand.vmem [shape: f32[1,256], index: 1, kind: output, shape index: {}, may-alias: {0,1}]  }
   0x1   :  { %v8_v1 = vld [vmem:[%s100_s0] sm:$0x3]  ;;  %v48_v11 = vunpack.c.l.s4 %v83_v10 }
   0x2   :  { %v9_v2 = vmul.f32 %v8_v1, %v8_v1  ;;  %v12_v3 = vshrl.u32 %v11_v0, 7  ;;  %v26_v8 = vand.u32 127, %v11_v0  ;;  %vm69_vm4 = vcmp.lt.s32.totalorder %v11_v0, 256 }
   0x3   :  { %v49_v16 = vunpack.c.0.s8 %v48_v11 }
   0x4   :  { %v13_v4 = vsub.s32 0, %v12_v3  ;;  %v17_v5 = vsub.s32 1, %v12_v3  ;;  %v37_v9 = vadd.s32 128, %v26_v8  ;;  %v38_v12 = vand.u32 1, %v26_v8 }
   0x5   :  { %vm34_vm0 = vcmp.lt.s32.totalorder %v26_v8, 1  ;;  %vm27_vm1 = vcmp.lt.s32.totalorder %v26_v8, 127  ;;  %v52_v18 = vsub.s32 %v49_v16, %v12_v3 }
   0x6   :  { %v14_v6 = vrot.slane %v9_v2, %v13_v4  ;;  %v18_v7 = vrot.slane %v9_v2, %v17_v5  ;;  %v39_v13 = vand.u32 1, %v37_v9  ;;  %vm40_vm2 = vcmp.eq.s32.totalorder %v38_v12, 0 }
   0x8   :  { %30 = vrot.lane.b32.xlu1 %v14_v6, %s81_s8  ;;  %21 = vrot.lane.b32.xlu0 %v14_v6, %s82_s9  ;;  %vm41_vm3 = vcmp.eq.s32.totalorder %v39_v13, 0 }
   0xc   :  { %32 = vrot.lane.b32.xlu1 %v18_v7, %s81_s8  ;;  %23 = vrot.lane.b32.xlu0 %v18_v7, %s82_s9 }
  0x7a   :  { %v31_v14 = vpop.permute.xlu1 %30  ;;  %v22_v15 = vpop.permute.xlu0 %21 }
  0x7e   :  { %v33_v17 = vpop.permute.xlu1 %32  ;;  %v24_v19 = vpop.permute.xlu0 %23 }
  0x7f   :  { %v35_v20 = vsel %vm34_vm0, %v31_v14, %v33_v17  ;;  %v36_v21 = vsel %vm34_vm0, %v33_v17, %v31_v14  ;;  %v28_v22 = vsel %vm27_vm1, %v22_v15, %v24_v19  ;;  %v29_v23 = vsel %vm27_vm1, %v24_v19, %v22_v15 }
  0x80   :  { %v42_v24 = vsel %vm40_vm2, %v28_v22, %v36_v21  ;;  %v43_v25 = vsel %vm41_vm3, %v29_v23, %v35_v20 }
  0x81   :  { %v46_v26 = vcombine.low %v42_v24, %v43_v25 }
  0x83   :  { %v53_v27 = vrot.slane %v46_v26, %v52_v18 }
  0x85   :  { %v60_v28 = vrot.slane %v53_v27, %v52_v18 }
  0x87   :  { %v62_v29 = vadd.f32 %v60_v28, %v9_v2 }
  0x89   :  { %79 = vrsqrt.f32 %v62_v29 }
  0x96   :  { %v80_v30 = vpop.eup %79 }
  0x97   :  { %v64_v31 = vmul.f32 0.1402523, %v80_v30 }
  0x99   :  { %v65_v32 = vmin.f32 %v64_v31, 1.0 }
  0x9b   :  { %v66_v33 = vmul.f32 %v65_v32, %v8_v1 }
  0x9d   :  { %71 = vst.msk [vmem:[%s101_s1] sm:$0x3] %vm69_vm4, %v66_v33 }

</bundles_post_ra>
